<compile_context>
chip_gen: v7x
topology: tpu7x:2x2x1
jax: 0.10.0
libtpu: 0.0.40
codegen_flags: <defaults>
</compile_context>

<pallas_src>
import functools

import jax
import jax.numpy as jnp
from jax.experimental import pallas as pl
from jax.experimental.pallas import tpu as pltpu

LANE = 128


def _round_up(x, m):
    return (x + m - 1) // m * m


def _make_resnet_kernel(same_dims, n_layers, padded_dims):
    """Fused residual-MLP kernel body for one row tile.

    Ref order: x, then per hidden layer [W (or fused [W | W_res]), b],
    then W_out, b_out, then the output ref.
    Weights are bf16, biases f32; accumulation is f32 on the MXU.
    """

    def kernel(*refs):
        x_ref = refs[0]
        o_ref = refs[-1]
        prefs = refs[1:-1]

        # Activations live in f32 between layers; cast to bf16 only for the MXU.
        fea_f32 = x_ref[...].astype(jnp.float32)
        idx = 0
        for li in range(n_layers):
            w = prefs[idx][...]          # bf16 (Fin_p, Fout_p) or (Fin_p, 2*Fout_p)
            b = prefs[idx + 1][...]      # f32  (1, Fout_p)  -- broadcast once per layer
            idx += 2
            fea_bf = fea_f32.astype(jnp.bfloat16)
            acc = jnp.dot(fea_bf, w, preferred_element_type=jnp.float32)
            if same_dims[li]:
                h = jnp.maximum(acc + b, 0.0)           # ReLU(fc(x))
                fea_f32 = h + fea_f32                   # identity residual
            else:
                fout = padded_dims[li + 1]              # 128-aligned split point
                h = jnp.maximum(acc[:, :fout] + b, 0.0)  # main branch
                fea_f32 = h + acc[:, fout:]             # fused projection residual
        w_out = prefs[idx][...]
        b_out = prefs[idx + 1][...]
        out = jnp.dot(fea_f32.astype(jnp.bfloat16), w_out,
                      preferred_element_type=jnp.float32) + b_out
        o_ref[...] = out.astype(o_ref.dtype)

    return kernel


class ResidualNetworkPallas:
    """Deterministically-initialized JAX/Pallas port of ResidualNetwork."""

    def __init__(self, input_dim, output_dim, hidden_layer_dims, key):
        dims = [input_dim] + list(hidden_layer_dims)
        self.dims = dims
        self.output_dim = output_dim
        self.same_dims = tuple(dims[i] == dims[i + 1] for i in range(len(dims) - 1))
        self.n_layers = len(dims) - 1
        self.padded_dims = tuple(_round_up(d, LANE) for d in dims)
        self.padded_out = _round_up(output_dim, LANE)
        # TODO(synk): if_rezero=True path (alpha * relu(...)) not wired; module default is False.

        self.params = []   # packed (lane-padded, bf16 weights / f32 biases) in kernel ref order
        self.raw = []      # unpadded f32 params for the reference path

        for i in range(self.n_layers):
            key, kw, kb, kr = jax.random.split(key, 4)
            fan_in = dims[i]
            bound = 1.0 / float(fan_in ** 0.5)
            w = jax.random.uniform(kw, (dims[i], dims[i + 1]), jnp.float32, -bound, bound)
            b = jax.random.uniform(kb, (1, dims[i + 1]), jnp.float32, -bound, bound)
            fin_p, fout_p = self.padded_dims[i], self.padded_dims[i + 1]
            b_p = jnp.zeros((1, fout_p), jnp.float32).at[:, :dims[i + 1]].set(b)
            if self.same_dims[i]:
                w_p = jnp.zeros((fin_p, fout_p), jnp.float32)
                w_p = w_p.at[:dims[i], :dims[i + 1]].set(w)
                self.params += [w_p.astype(jnp.bfloat16), b_p]
                self.raw.append(("same", w, b))
            else:
                wres = jax.random.uniform(kr, (dims[i], dims[i + 1]), jnp.float32,
                                          -bound, bound)
                # Fuse main + residual projection into one weight -> one MXU pass.
                w_p = jnp.zeros((fin_p, 2 * fout_p), jnp.float32)
                w_p = w_p.at[:dims[i], :dims[i + 1]].set(w)
                w_p = w_p.at[:dims[i], fout_p:fout_p + dims[i + 1]].set(wres)
                self.params += [w_p.astype(jnp.bfloat16), b_p]
                self.raw.append(("proj", w, b, wres))

        key, kw, kb = jax.random.split(key, 3)
        bound = 1.0 / float(dims[-1] ** 0.5)
        w_out = jax.random.uniform(kw, (dims[-1], output_dim), jnp.float32, -bound, bound)
        b_out = jax.random.uniform(kb, (1, output_dim), jnp.float32, -bound, bound)
        w_out_p = jnp.zeros((self.padded_dims[-1], self.padded_out), jnp.float32)
        w_out_p = w_out_p.at[:dims[-1], :output_dim].set(w_out)
        b_out_p = jnp.zeros((1, self.padded_out), jnp.float32).at[:, :output_dim].set(b_out)
        self.params += [w_out_p.astype(jnp.bfloat16), b_out_p]
        self.raw_out = (w_out, b_out)

    @functools.partial(jax.jit, static_argnums=0)
    def __call__(self, fea):
        n = fea.shape[0]
        fin_p = self.padded_dims[0]
        out_p = self.padded_out

        # Row tile: 512 keeps the auto-pipeline near the HBM roofline for large N while
        # staying well under the 64 MiB v7x VMEM; tiny inputs collapse to a single tile.
        tile_n = 512 if n >= 512 else max(8, _round_up(n, 8))
        n_pad = _round_up(n, tile_n)

        # Zero-pad tail rows and feature lanes; activations travel as bf16.
        x = jnp.zeros((n_pad, fin_p), jnp.bfloat16)
        x = x.at[:n, :self.dims[0]].set(fea.astype(jnp.bfloat16))

        kernel = _make_resnet_kernel(self.same_dims, self.n_layers, self.padded_dims)

        x_spec = pl.BlockSpec((tile_n, fin_p), lambda i: (i, 0))
        # Weights/biases: full-array blocks with a constant index_map -> stay VMEM-resident
        # across all row tiles (no re-DMA per grid step).
        w_specs = [pl.BlockSpec(p.shape, lambda i: (0, 0)) for p in self.params]
        out_spec = pl.BlockSpec((tile_n, out_p), lambda i: (i, 0))

        out = pl.pallas_call(
            kernel,
            out_shape=jax.ShapeDtypeStruct((n_pad, out_p), jnp.float32),
            grid=(n_pad // tile_n,),
            in_specs=[x_spec] + w_specs,
            out_specs=out_spec,
            compiler_params=pltpu.CompilerParams(
                dimension_semantics=("parallel",),   # shard row tiles across v7x's 2 TCs
                vmem_limit_bytes=48 * 1024 * 1024,   # headroom on all generations
            ),
        )(x, *self.params)
        return out[:n, :self.output_dim]

    # Pure-JAX reference using the same bf16-operand / f32-accumulate numerics.
    def reference(self, fea):
        def bdot(a, w):
            return jnp.dot(a.astype(jnp.bfloat16), w.astype(jnp.bfloat16),
                           preferred_element_type=jnp.float32)

        fea = fea.astype(jnp.bfloat16).astype(jnp.float32)
        for entry in self.raw:
            if entry[0] == "same":
                _, w, b = entry
                fea = jnp.maximum(bdot(fea, w) + b, 0.0) + fea
            else:
                _, w, b, wres = entry
                fea = jnp.maximum(bdot(fea, w) + b, 0.0) + bdot(fea, wres)
        w_out, b_out = self.raw_out
        return bdot(fea, w_out) + b_out


if __name__ == "__main__":
    key = jax.random.PRNGKey(0)
    k_param, k_x = jax.random.split(key)

    # 16->32 (projection residual), 32->32 (identity residual), fc_out 32->8
    input_dim, output_dim, hidden = 16, 8, [32, 32]
    model = ResidualNetworkPallas(input_dim, output_dim, hidden, k_param)

    batch = 8
    x = jax.random.normal(k_x, (batch, input_dim), jnp.float32)

    out = model(x)
    out = jax.block_until_ready(out)

    ref = model.reference(x)
    assert out.shape == (batch, output_dim)
    # bf16 operands -> allow a small numerical slack vs the (identically-quantized) reference.
    assert jnp.allclose(out, ref, atol=1e-2, rtol=1e-2), "mismatch vs reference"

    print("KERNEL_OK")
</pallas_src>

<mosaic_0001>
module attributes {stable_mosaic.version = 11 : i64} {
  func.func @kernel(%arg0: i32, %arg1: memref<8x128xbf16, #tpu.memory_space<vmem>>, %arg2: memref<128x256xbf16, #tpu.memory_space<vmem>>, %arg3: memref<1x128xf32, #tpu.memory_space<vmem>>, %arg4: memref<128x128xbf16, #tpu.memory_space<vmem>>, %arg5: memref<1x128xf32, #tpu.memory_space<vmem>>, %arg6: memref<128x128xbf16, #tpu.memory_space<vmem>>, %arg7: memref<1x128xf32, #tpu.memory_space<vmem>>, %arg8: memref<8x128xf32, #tpu.memory_space<vmem>>) attributes {dimension_semantics = [#tpu.dimension_semantics<parallel>], iteration_bounds = array<i64: 1>, scalar_prefetch = 0 : i64, scratch_operands = 0 : i64, tpu.core_type = #tpu.core_type<tc>, window_params = [{transform_indices = @transform_0, window_bounds = array<i64: 8, 128>}, {pipeline_mode = #tpu.pipeline_mode<synchronous>, transform_indices = @transform_1, window_bounds = array<i64: 128, 256>}, {pipeline_mode = #tpu.pipeline_mode<synchronous>, transform_indices = @transform_2, window_bounds = array<i64: 1, 128>}, {pipeline_mode = #tpu.pipeline_mode<synchronous>, transform_indices = @transform_3, window_bounds = array<i64: 128, 128>}, {pipeline_mode = #tpu.pipeline_mode<synchronous>, transform_indices = @transform_4, window_bounds = array<i64: 1, 128>}, {pipeline_mode = #tpu.pipeline_mode<synchronous>, transform_indices = @transform_5, window_bounds = array<i64: 128, 128>}, {pipeline_mode = #tpu.pipeline_mode<synchronous>, transform_indices = @transform_6, window_bounds = array<i64: 1, 128>}, {transform_indices = @transform_7, window_bounds = array<i64: 8, 128>}]} {
    %c0 = arith.constant 0 : index
    %c0_0 = arith.constant 0 : index
    %0 = vector.load %arg1[%c0, %c0_0] : memref<8x128xbf16, #tpu.memory_space<vmem>>, vector<8x128xbf16>
    %1 = arith.extf %0 : vector<8x128xbf16> to vector<8x128xf32>
    %c0_1 = arith.constant 0 : index
    %c0_2 = arith.constant 0 : index
    %2 = vector.load %arg2[%c0_1, %c0_2] : memref<128x256xbf16, #tpu.memory_space<vmem>>, vector<128x256xbf16>
    %c0_3 = arith.constant 0 : index
    %c0_4 = arith.constant 0 : index
    %3 = vector.load %arg3[%c0_3, %c0_4] : memref<1x128xf32, #tpu.memory_space<vmem>>, vector<1x128xf32>
    %4 = arith.truncf %1 : vector<8x128xf32> to vector<8x128xbf16>
    %cst = arith.constant dense<0.000000e+00> : vector<8x256xf32>
    %5 = tpu.matmul %4, %2, %cst {dimension_numbers = #tpu.dot_dimension_numbers<[1], [0], [0], [1], [0, 0, 1, 1], [], []>} : vector<8x128xbf16>, vector<128x256xbf16>, vector<8x256xf32> -> vector<8x256xf32>
    %6 = vector.extract_strided_slice %5 {offsets = [0, 0], sizes = [8, 128], strides = [1, 1]} : vector<8x256xf32> to vector<8x128xf32>
    %7 = vector.broadcast %3 : vector<1x128xf32> to vector<8x128xf32>
    %8 = arith.addf %6, %7 : vector<8x128xf32>
    %cst_5 = arith.constant 0.000000e+00 : f32
    %9 = vector.broadcast %cst_5 : f32 to vector<8x128xf32>
    %10 = arith.maximumf %8, %9 : vector<8x128xf32>
    %11 = vector.extract_strided_slice %5 {offsets = [0, 128], sizes = [8, 128], strides = [1, 1]} : vector<8x256xf32> to vector<8x128xf32>
    %12 = arith.addf %10, %11 : vector<8x128xf32>
    %c0_6 = arith.constant 0 : index
    %c0_7 = arith.constant 0 : index
    %13 = vector.load %arg4[%c0_6, %c0_7] : memref<128x128xbf16, #tpu.memory_space<vmem>>, vector<128x128xbf16>
    %c0_8 = arith.constant 0 : index
    %c0_9 = arith.constant 0 : index
    %14 = vector.load %arg5[%c0_8, %c0_9] : memref<1x128xf32, #tpu.memory_space<vmem>>, vector<1x128xf32>
    %15 = arith.truncf %12 : vector<8x128xf32> to vector<8x128xbf16>
    %cst_10 = arith.constant dense<0.000000e+00> : vector<8x128xf32>
    %16 = tpu.matmul %15, %13, %cst_10 {dimension_numbers = #tpu.dot_dimension_numbers<[1], [0], [0], [1], [0, 0, 1, 1], [], []>} : vector<8x128xbf16>, vector<128x128xbf16>, vector<8x128xf32> -> vector<8x128xf32>
    %17 = vector.broadcast %14 : vector<1x128xf32> to vector<8x128xf32>
    %18 = arith.addf %16, %17 : vector<8x128xf32>
    %cst_11 = arith.constant 0.000000e+00 : f32
    %19 = vector.broadcast %cst_11 : f32 to vector<8x128xf32>
    %20 = arith.maximumf %18, %19 : vector<8x128xf32>
    %21 = arith.addf %20, %12 : vector<8x128xf32>
    %c0_12 = arith.constant 0 : index
    %c0_13 = arith.constant 0 : index
    %22 = vector.load %arg6[%c0_12, %c0_13] : memref<128x128xbf16, #tpu.memory_space<vmem>>, vector<128x128xbf16>
    %c0_14 = arith.constant 0 : index
    %c0_15 = arith.constant 0 : index
    %23 = vector.load %arg7[%c0_14, %c0_15] : memref<1x128xf32, #tpu.memory_space<vmem>>, vector<1x128xf32>
    %24 = arith.truncf %21 : vector<8x128xf32> to vector<8x128xbf16>
    %cst_16 = arith.constant dense<0.000000e+00> : vector<8x128xf32>
    %25 = tpu.matmul %24, %22, %cst_16 {dimension_numbers = #tpu.dot_dimension_numbers<[1], [0], [0], [1], [0, 0, 1, 1], [], []>} : vector<8x128xbf16>, vector<128x128xbf16>, vector<8x128xf32> -> vector<8x128xf32>
    %26 = vector.broadcast %23 : vector<1x128xf32> to vector<8x128xf32>
    %27 = arith.addf %25, %26 : vector<8x128xf32>
    %c0_17 = arith.constant 0 : index
    %c0_18 = arith.constant 0 : index
    %28 = vector.load %arg8[%c0_17, %c0_18] : memref<8x128xf32, #tpu.memory_space<vmem>>, vector<8x128xf32>
    tpu.vector_store %arg8[%c0_17, %c0_18], %27 {strides = array<i32>} : memref<8x128xf32, #tpu.memory_space<vmem>>, vector<8x128xf32>,
    return
  }
  func.func @transform_0(%arg0: i32) -> (i32, i32) {
    %c0_i32 = arith.constant 0 : i32
    %c0_i32_0 = arith.constant 0 : i32
    return %arg0, %c0_i32 : i32, i32
  }
  func.func @transform_1(%arg0: i32) -> (i32, i32) {
    %c0_i32 = arith.constant 0 : i32
    %c0_i32_0 = arith.constant 0 : i32
    %c0_i32_1 = arith.constant 0 : i32
    return %c0_i32, %c0_i32_0 : i32, i32
  }
  func.func @transform_2(%arg0: i32) -> (i32, i32) {
    %c0_i32 = arith.constant 0 : i32
    %c0_i32_0 = arith.constant 0 : i32
    %c0_i32_1 = arith.constant 0 : i32
    return %c0_i32, %c0_i32_0 : i32, i32
  }
  func.func @transform_3(%arg0: i32) -> (i32, i32) {
    %c0_i32 = arith.constant 0 : i32
    %c0_i32_0 = arith.constant 0 : i32
    %c0_i32_1 = arith.constant 0 : i32
    return %c0_i32, %c0_i32_0 : i32, i32
  }
  func.func @transform_4(%arg0: i32) -> (i32, i32) {
    %c0_i32 = arith.constant 0 : i32
    %c0_i32_0 = arith.constant 0 : i32
    %c0_i32_1 = arith.constant 0 : i32
    return %c0_i32, %c0_i32_0 : i32, i32
  }
  func.func @transform_5(%arg0: i32) -> (i32, i32) {
    %c0_i32 = arith.constant 0 : i32
    %c0_i32_0 = arith.constant 0 : i32
    %c0_i32_1 = arith.constant 0 : i32
    return %c0_i32, %c0_i32_0 : i32, i32
  }
  func.func @transform_6(%arg0: i32) -> (i32, i32) {
    %c0_i32 = arith.constant 0 : i32
    %c0_i32_0 = arith.constant 0 : i32
    %c0_i32_1 = arith.constant 0 : i32
    return %c0_i32, %c0_i32_0 : i32, i32
  }
  func.func @transform_7(%arg0: i32) -> (i32, i32) {
    %c0_i32 = arith.constant 0 : i32
    %c0_i32_0 = arith.constant 0 : i32
    return %arg0, %c0_i32 : i32, i32
  }
}

</mosaic_0001>

<bundles_post_ra>
// kernel: a_call__.1
= control target key start
LH: loop header
LB: loop body
LE: loop exit
PB: predicated region body
PF: predicated region fallthrough
CT: control target
= control target key end

     0   :  { %v578_v2 = vmov 0   ;;  %v579_v3 = vmov 0.0   ;;  %s760_s0 = inlined_call_operand.vmem [shape: bf16[8,128], index: 0, kind: input, shape index: {}]   ;;  %s761_s1 = inlined_call_operand.vmem [shape: bf16[128,256], index: 1, kind: input, shape index: {}]   ;;  %s762_s2 = inlined_call_operand.vmem [shape: f32[1,128], index: 2, kind: input, shape index: {}]   ;;  %s763_s3 = inlined_call_operand.vmem [shape: bf16[128,128], index: 3, kind: input, shape index: {}]   ;;  %s764_s4 = inlined_call_operand.vmem [shape: f32[1,128], index: 4, kind: input, shape index: {}]   ;;  %s765_s5 = inlined_call_operand.vmem [shape: bf16[128,128], index: 5, kind: input, shape index: {}]   ;;  %s766_s6 = inlined_call_operand.vmem [shape: f32[1,128], index: 6, kind: input, shape index: {}]   ;;  %s767_s7 = inlined_call_operand.hbm [shape: f32[8,128], index: 7, kind: output, shape index: {}]  }
   0x1   :  { %v514_v0 = vld [vmem:[%s761_s1 + $0x4] ss:$8 sps:$4 sm:$0xff]   ;;  %v516_v1 = vld [vmem:[%s761_s1] ss:$8 sps:$4 sm:$0xff]   ;;  %158 = vmatprep.mubr.bf16.mxu0 %v578_v2  ;;  %470 = vmatprep.subr.bf16.mxu1 %v579_v3  ;;  %v517_v4 = vld [vmem:[%s761_s1 + $0x14] ss:$8 sps:$4 sm:$0xff]  }
   0x2   :  { %126 = vmatprep.subr.bf16.mxu0 %v514_v0  ;;  %v519_v5 = vld [vmem:[%s761_s1 + $0x10] ss:$8 sps:$4 sm:$0xff]   ;;  %v520_v6 = vld [vmem:[%s761_s1 + $0x24] ss:$8 sps:$4 sm:$0xff]   ;;  %v522_v7 = vld [vmem:[%s761_s1 + $0x20] ss:$8 sps:$4 sm:$0xff]  }
   0x3   :  { %127 = vmatpush1.bf16.msra.mxu0 %v516_v1  ;;  %v523_v8 = vld [vmem:[%s761_s1 + $0x34] ss:$8 sps:$4 sm:$0xff]   ;;  %v525_v9 = vld [vmem:[%s761_s1 + $0x30] ss:$8 sps:$4 sm:$0xff]   ;;  %v538_v10 = vld [vmem:[%s763_s3] sm:$0xff]  }
   0x4   :  { %128 = vmatprep.subr.bf16.mxu0 %v517_v4  ;;  %v526_v11 = vld [vmem:[%s761_s1 + $0x44] ss:$8 sps:$4 sm:$0xff]   ;;  %471 = vmatpush3.bf16.msra.mxu1 %v538_v10  ;;  %v528_v13 = vld [vmem:[%s761_s1 + $0x40] ss:$8 sps:$4 sm:$0xff]   ;;  %v529_v14 = vld [vmem:[%s761_s1 + $0x54] ss:$8 sps:$4 sm:$0xff]  }
   0x5   :  { %v539_v12 = vld [vmem:[%s763_s3 + $0x8] sm:$0xff]   ;;  %472 = vmatprep.subr.bf16.mxu1 %v579_v3  ;;  %v531_v15 = vld [vmem:[%s761_s1 + $0x50] ss:$8 sps:$4 sm:$0xff]   ;;  %v535_v20 = vld [vmem:[%s761_s1 + $0x74] ss:$8 sps:$4 sm:$0xff]  }
   0x6   :  { %v540_v16 = vld [vmem:[%s763_s3 + $0x10] sm:$0xff]   ;;  %v532_v17 = vld [vmem:[%s761_s1 + $0x64] ss:$8 sps:$4 sm:$0xff]   ;;  %v541_v18 = vld [vmem:[%s763_s3 + $0x18] sm:$0xff]  }
   0x7   :  { %129 = vmatpush1.bf16.msra.mxu0 %v519_v5  ;;  %v534_v19 = vld [vmem:[%s761_s1 + $0x60] ss:$8 sps:$4 sm:$0xff]  }
   0x8   :  { %130 = vmatprep.subr.bf16.mxu0 %v520_v6  ;;  %473 = vmatpush3.bf16.msra.mxu1 %v539_v12 }
   0x9   :  { %474 = vmatprep.subr.bf16.mxu1 %v579_v3 }
   0xb   :  { %131 = vmatpush1.bf16.msra.mxu0 %v522_v7 }
   0xc   :  { %132 = vmatprep.subr.bf16.mxu0 %v523_v8  ;;  %475 = vmatpush3.bf16.msra.mxu1 %v540_v16 }
   0xd   :  { %476 = vmatprep.subr.bf16.mxu1 %v579_v3 }
   0xf   :  { %133 = vmatpush1.bf16.msra.mxu0 %v525_v9 }
  0x10   :  { %134 = vmatprep.subr.bf16.mxu0 %v526_v11 }
  0x13   :  { %135 = vmatpush1.bf16.msra.mxu0 %v528_v13 }
  0x14   :  { %136 = vmatprep.subr.bf16.mxu0 %v529_v14 }
  0x17   :  { %137 = vmatpush1.bf16.msra.mxu0 %v531_v15 }
  0x18   :  { %138 = vmatprep.subr.bf16.mxu0 %v532_v17 }
  0x19   :  { %12 = vsyncpa [#allocation3], 0  ;;  %477 = vmatpush3.bf16.msra.mxu1 %v541_v18  ;;  %v542_v21 = vld [vmem:[%s763_s3 + $0x20] sm:$0xff]   ;;  %v537_v22 = vld [vmem:[%s761_s1 + $0x70] ss:$8 sps:$4 sm:$0xff]   ;;  %vm580_vm0 = vmmov 0  }
  0x1a   :  { %478 = vmatprep.subr.bf16.mxu1 %v579_v3  ;;  %v543_v23 = vld [vmem:[%s763_s3 + $0x28] sm:$0xff]   ;;  %v28_v24 = vld [vmem:[%s760_s0] sm:$0xf]  ;;  %v544_v25 = vld [vmem:[%s763_s3 + $0x30] sm:$0xff]   ;;  %486 = vmatprep.mubr.msk.bf16.mxu1 %vm580_vm0, %v579_v3  ;;  %s581_s23 = smov [#allocation2]  }
  0x1b   :  { %139 = vmatpush1.bf16.msra.mxu0 %v534_v19  ;;  %v545_v26 = vld [vmem:[%s763_s3 + $0x38] sm:$0xff]   ;;  %v546_v27 = vld [vmem:[%s765_s5] sm:$0xff]   ;;  %v547_v28 = vld [vmem:[%s765_s5 + $0x8] sm:$0xff]  }
  0x1c   :  { %140 = vmatprep.subr.bf16.mxu0 %v535_v20  ;;  %v548_v29 = vld [vmem:[%s765_s5 + $0x10] sm:$0xff]   ;;  %v549_v30 = vld [vmem:[%s765_s5 + $0x18] sm:$0xff]   ;;  %v550_v31 = vld [vmem:[%s765_s5 + $0x20] sm:$0xff]  }
  0x1d   :  { %479 = vmatpush3.bf16.msra.mxu1 %v542_v21  ;;  %v551_v32 = vld [vmem:[%s765_s5 + $0x28] sm:$0xff]   ;;  %v433_v33 = vld [vmem:[%s762_s2] ss:$0 sm:$0xff]  ;;  %v552_v42 = vld [vmem:[%s765_s5 + $0x30] sm:$0xff]  }
  0x1e   :  { %480 = vmatprep.subr.bf16.mxu1 %v579_v3  ;;  %v553_v43 = vld [vmem:[%s765_s5 + $0x38] sm:$0xff]   ;;  %v434_v44 = vld [vmem:[%s764_s4] ss:$0 sm:$0xff]  ;;  %s409_s5 = sshll.u32 %s581_s23, 4  ;;  %s410_s5 = int_to_ptr.vmem [resolvable:$true] %s409_s5 }
  0x1f   :  { %141 = vmatpush1.bf16.msra.mxu0 %v537_v22  ;;  %v443_v53 = vld [vmem:[%s766_s6] ss:$0 sm:$0xff]  ;;  %s554_s4 = scalar_lea.vmem %s410_s5, 128  ;;  %p559_p1 = scmp.lt.s32.totalorder %s410_s5, %s410_s5 }
  0x20   :  { %490 = vmatprep.subr.bf16.mxu0 %v579_v3  ;;  %p555_p0 = scmp.ne.s32.totalorder %s410_s5, %s554_s4  ;;  %p560_p2 = scmp.lt.s32.totalorder %s554_s4, %s554_s4 }
  0x21   :  { %481 = vmatpush3.bf16.msra.mxu1 %v543_v23 }
  0x22   :  { %159 = vmatmul.mubr.bf16.vlgmr.msra.gmra.mrb[0].mxu0 %v28_v24  ;;  %482 = vmatprep.subr.bf16.mxu1 %v579_v3  ;;  %p561_p3 = por %p560_p2, %p559_p1 }
  0x23   :  { %506 = vmatprep.mubr.msk.bf16.mxu0 %vm580_vm0, %v579_v3  ;;  %491 = vmatpush3.bf16.msra.mxu0 %v546_v27 }
  0x24   :  { %492 = vmatprep.subr.bf16.mxu0 %v579_v3  ;;  %p562_p4 = pnand %p561_p3, %p555_p0 }
  0x25   :  { %483 = vmatpush3.bf16.msra.mxu1 %v544_v25 }
  0x26   :  { %484 = vmatprep.subr.bf16.mxu1 %v579_v3 }
  0x27   :  { %493 = vmatpush3.bf16.msra.mxu0 %v547_v28 }
  0x28   :  { %494 = vmatprep.subr.bf16.mxu0 %v579_v3 }
  0x29   :  { %485 = vmatpush3.bf16.msra.mxu1 %v545_v26 }
  0x2b   :  { %495 = vmatpush3.bf16.msra.mxu0 %v548_v29 }
  0x2c   :  { %496 = vmatprep.subr.bf16.mxu0 %v579_v3 }
  0x2f   :  { %497 = vmatpush3.bf16.msra.mxu0 %v549_v30 }
  0x30   :  { %498 = vmatprep.subr.bf16.mxu0 %v579_v3 }
  0x33   :  { %499 = vmatpush3.bf16.msra.mxu0 %v550_v31 }
  0x34   :  { %500 = vmatprep.subr.bf16.mxu0 %v579_v3 }
  0x37   :  { %501 = vmatpush3.bf16.msra.mxu0 %v551_v32 }
  0x38   :  { %502 = vmatprep.subr.bf16.mxu0 %v579_v3 }
  0x3b   :  { %503 = vmatpush3.bf16.msra.mxu0 %v552_v42 }
  0x3c   :  { %504 = vmatprep.subr.bf16.mxu0 %v579_v3 }
  0x3f   :  { %505 = vmatpush3.bf16.msra.mxu0 %v553_v43 }
  0xf5   :  { %v160_v34 = vpop.f32.mrb[0].mxu0 }
  0xf6   :  { %v173_v35 = vadd.f32 %v433_v33, %v160_v34  ;;  %v162_v36 = vpop.f32.mrb[1].mxu0 }
  0xf7   :  { %v164_v37 = vpop.f32.mrb[2].mxu0 }
  0xf8   :  { %v174_v38 = vmax.f32 %v173_v35, 0.0  ;;  %v165_v39 = vpop.f32.mrb[3].mxu0 }
  0xfa   :  { %v175_v40 = vadd.f32 %v174_v38, %v162_v36 }
  0xfc   :  { %v193_v41 = vpack.c.bf16 %v175_v40, %v175_v40 }
  0xfe   :  { %487 = vmatmul.mubr.bf16.vlgmr.msra.gmra.mrb[0].mxu1 %v193_v41 }
 0x1d1   :  { %v282_v45 = vpop.f32.mrb[0].mxu1 }
 0x1d2   :  { %v283_v46 = vadd.f32 %v434_v44, %v282_v45  ;;  %v488_v47 = vpop.f32.mrb[1].mxu1 }
 0x1d3   :  { %v285_v48 = vpop.f32.mrb[2].mxu1 }
 0x1d4   :  { %v288_v49 = vmax.f32 %v283_v46, 0.0  ;;  %v489_v50 = vpop.f32.mrb[3].mxu1 }
 0x1d6   :  { %v289_v51 = vadd.f32 %v288_v49, %v175_v40 }
 0x1d8   :  { %v307_v52 = vpack.c.bf16 %v289_v51, %v289_v51 }
 0x1da   :  { %507 = vmatmul.mubr.bf16.vlgmr.msra.gmra.mrb[4].mxu0 %v307_v52 }
 0x2ad   :  { %v396_v54 = vpop.f32.mrb[4].mxu0 }
 0x2ae   :  { %v397_v55 = vadd.f32 %v443_v53, %v396_v54  ;;  %v508_v56 = vpop.f32.mrb[5].mxu0 }
 0x2af   :  { %v399_v57 = vpop.f32.mrb[6].mxu0 }
 0x2b0   :  { %402 = vst [vmem:[#allocation2] sm:$0xff] %v397_v55  ;;  %v509_v58 = vpop.f32.mrb[7].mxu0 }
 0x2b1   :  { %565 = shalt.err (!%p562_p4)
}
 0x2b2   :  { %s566_s6 = scalar_lea.hbm %s767_s7, 128 }
 0x2b3   :  { %p567_p5 = scmp.ne.s32.totalorder %s767_s7, %s566_s6  ;;  %p570_p6 = scmp.lt.u32.totalorder %s566_s6, %s767_s7 }
 0x2b5   :  { %p572_p7 = pnand %p570_p6, %p567_p5 }
 0x2b7   :  { %575 = shalt.err (!%p572_p7)
}
 0x2b8   :  { %412 = dma.vmem_to_hbm [thread:$0]  %s410_s5, 128, %s767_s7, [#allocation3]  }
 0x2b9   :  { %576 = dma.done.wait [#allocation3], 128  }
 0x2ba   :  { %577 = vsyncadd [#allocation3], 4294967168 }
 0x2bb   :  { %416 = vsyncpa [#allocation3], 1 }

</bundles_post_ra>
